<compile_context>
chip_gen: v7x
topology: tpu7x:2x2x1
jax: 0.10.0
libtpu: 0.0.40
codegen_flags: <defaults>
</compile_context>

<pallas_src>
import functools

import jax
import jax.numpy as jnp
from jax.experimental import pallas as pl
from jax.experimental.pallas import tpu as pltpu

BN_EPS = 1e-5
NEG_SLOPE = 0.2


def _round_up(x, m):
    return ((x + m - 1) // m) * m


# --------------------------------------------------------------------------
# Pass 1: conv-as-matmul (bf16 in, f32 accumulate) + streamed BN statistics.
# grid = (nm, nk).  K axis accumulates the matmul into acc_ref; the stats
# output block has a constant index map, so it stays resident in VMEM for the
# whole grid and collects per-channel sum / sum-of-squares across all M tiles.
# --------------------------------------------------------------------------
def conv_stats_kernel(p_ref, w_ref, y_ref, stats_ref, acc_ref):
    i = pl.program_id(0)
    k = pl.program_id(1)
    nk = pl.num_programs(1)

    # Zero the global stats accumulator once, at the very first grid step.
    @pl.when(jnp.logical_and(i == 0, k == 0))
    def _():
        stats_ref[...] = jnp.zeros_like(stats_ref)

    # Zero the per-M-tile matmul accumulator at the start of the K loop.
    @pl.when(k == 0)
    def _():
        acc_ref[...] = jnp.zeros_like(acc_ref)

    acc_ref[...] += jnp.dot(
        p_ref[...], w_ref[...], preferred_element_type=jnp.float32
    )

    # Finalize this M tile: emit conv output, fold its stats into the totals.
    @pl.when(k == nk - 1)
    def _():
        acc = acc_ref[...]
        y_ref[...] = acc
        stats_ref[0:1, :] += jnp.sum(acc, axis=0, keepdims=True)
        stats_ref[1:2, :] += jnp.sum(acc * acc, axis=0, keepdims=True)


# --------------------------------------------------------------------------
# Pass 2: BatchNorm (batch stats, folded into one scale/shift) + LeakyReLU.
# Purely elementwise over lane-dense [TM, OCP] tiles -> "parallel" M axis.
# --------------------------------------------------------------------------
def bn_act_kernel(y_ref, stats_ref, g_ref, b_ref, o_ref, *, inv_count):
    mean = stats_ref[0:1, :] * inv_count
    var = stats_ref[1:2, :] * inv_count - mean * mean       # biased variance
    var = jnp.maximum(var, 0.0)                              # guard cancellation
    scale = g_ref[...] * jax.lax.rsqrt(var + BN_EPS)
    shift = b_ref[...] - scale * mean
    y = y_ref[...] * scale + shift
    o_ref[...] = jnp.where(y > 0, y, NEG_SLOPE * y).astype(o_ref.dtype)


def conv_block_forward(x, weight, bias, gamma, beta, *, stride, padding):
    """x: [N, C, H, W] NCHW f32; weight: [OC, C, KH, KW]; bias/gamma/beta: [OC]."""
    n, c, h, w = x.shape
    oc, _, kh, kw = weight.shape
    oh = (h + 2 * padding - kh) // stride + 1
    ow = (w + 2 * padding - kw) // stride + 1

    # --- plain-JAX glue: im2col ---------------------------------------------
    # TODO(synk): replace with in-kernel strided DMA to avoid the KH*KW HBM copy.
    x_pad = jnp.pad(x, ((0, 0), (0, 0), (padding, padding), (padding, padding)))
    taps = []
    for i in range(kh):
        for j in range(kw):
            taps.append(
                x_pad[:, :, i : i + stride * oh : stride, j : j + stride * ow : stride]
            )  # each [N, C, OH, OW]
    patches = jnp.stack(taps, axis=2)                         # [N, C, KH*KW, OH, OW]
    patches = patches.reshape(n, c * kh * kw, oh, ow)         # matches weight flattening
    patches = patches.transpose(0, 2, 3, 1).reshape(n * oh * ow, c * kh * kw)  # [M, K]

    w_mat = weight.reshape(oc, c * kh * kw).T                 # [K, OC]
    # Conv bias dropped: a per-channel constant cancels under batch-stat BN.
    del bias

    m_dim, k_dim = patches.shape

    # --- tiling / padding (lane-dense, bf16-friendly) -------------------------
    ocp = _round_up(oc, 128)                 # lane-dense output channels
    m_r = _round_up(m_dim, 16)               # bf16 sublane packing friendly
    tm = min(512, m_r)
    m_pad = _round_up(m_dim, tm)
    k_r = _round_up(k_dim, 128)
    tk = min(512, k_r)
    k_pad = _round_up(k_dim, tk)
    nm = m_pad // tm
    nk = k_pad // tk

    # Zero padding: padded rows/cols/channels contribute nothing to the matmul
    # or the BN statistics (true element count m_dim is used for the mean).
    patches_p = (
        jnp.zeros((m_pad, k_pad), jnp.bfloat16)
        .at[:m_dim, :k_dim]
        .set(patches.astype(jnp.bfloat16))
    )
    w_p = (
        jnp.zeros((k_pad, ocp), jnp.bfloat16)
        .at[:k_dim, :oc]
        .set(w_mat.astype(jnp.bfloat16))
    )
    g_row = jnp.zeros((1, ocp), jnp.float32).at[:, :oc].set(gamma.reshape(1, oc))
    b_row = jnp.zeros((1, ocp), jnp.float32).at[:, :oc].set(beta.reshape(1, oc))

    # --- pass 1: tiled conv + streamed BN sum / sum-of-squares ----------------
    conv_out, stats = pl.pallas_call(
        conv_stats_kernel,
        out_shape=(
            jax.ShapeDtypeStruct((m_pad, ocp), jnp.float32),   # conv output (staged)
            jax.ShapeDtypeStruct((8, ocp), jnp.float32),       # rows 0/1: sum, sum-sq
        ),
        grid=(nm, nk),
        in_specs=[
            pl.BlockSpec((tm, tk), lambda i, k: (i, k)),
            pl.BlockSpec((tk, ocp), lambda i, k: (k, 0)),
        ],
        out_specs=(
            pl.BlockSpec((tm, ocp), lambda i, k: (i, 0)),
            pl.BlockSpec((8, ocp), lambda i, k: (0, 0)),       # resident accumulator
        ),
        scratch_shapes=[pltpu.VMEM((tm, ocp), jnp.float32)],
        compiler_params=pltpu.CompilerParams(
            dimension_semantics=("arbitrary", "arbitrary"),
            vmem_limit_bytes=32 * 1024 * 1024,
        ),
        cost_estimate=pl.CostEstimate(
            flops=2 * m_pad * k_pad * ocp,
            transcendentals=0,
            bytes_accessed=(m_pad * k_pad + k_pad * ocp) * 2
            + (m_pad * ocp + 8 * ocp) * 4,
        ),
    )(patches_p, w_p)

    # --- pass 2: fused BatchNorm + LeakyReLU, lane-dense, megacore-parallel ---
    out_flat = pl.pallas_call(
        functools.partial(bn_act_kernel, inv_count=1.0 / float(m_dim)),
        out_shape=jax.ShapeDtypeStruct((m_pad, ocp), jnp.float32),
        grid=(nm,),
        in_specs=[
            pl.BlockSpec((tm, ocp), lambda i: (i, 0)),
            pl.BlockSpec((8, ocp), lambda i: (0, 0)),
            pl.BlockSpec((1, ocp), lambda i: (0, 0)),
            pl.BlockSpec((1, ocp), lambda i: (0, 0)),
        ],
        out_specs=pl.BlockSpec((tm, ocp), lambda i: (i, 0)),
        compiler_params=pltpu.CompilerParams(
            dimension_semantics=("parallel",),
            vmem_limit_bytes=32 * 1024 * 1024,
        ),
    )(conv_out, stats, g_row, b_row)

    # [M_pad, OCP] -> valid [M, OC] -> [N, OH, OW, OC] -> NCHW
    return out_flat[:m_dim, :oc].reshape(n, oh, ow, oc).transpose(0, 3, 1, 2)


if __name__ == "__main__":
    # Small shapes consistent with a pix2pix down ConvBlock:
    # in_channels=4, out_channels=8, kernel_size=4, stride=2, padding=1
    N, C, H, W = 2, 4, 16, 16
    OC, KH, KW = 8, 4, 4
    STRIDE, PADDING = 2, 1

    key = jax.random.PRNGKey(0)
    kx, kw_, kb, kg, kbeta = jax.random.split(key, 5)

    x = jax.random.normal(kx, (N, C, H, W), dtype=jnp.float32)
    fan_in = C * KH * KW
    bound = 1.0 / (fan_in ** 0.5)
    weight = jax.random.uniform(kw_, (OC, C, KH, KW), jnp.float32, -bound, bound)
    bias = jax.random.uniform(kb, (OC,), jnp.float32, -bound, bound)
    gamma = jax.random.uniform(kg, (OC,), jnp.float32, 0.5, 1.5)
    beta = jax.random.uniform(kbeta, (OC,), jnp.float32, -0.5, 0.5)

    out = conv_block_forward(x, weight, bias, gamma, beta,
                             stride=STRIDE, padding=PADDING)
    jax.block_until_ready(out)
    assert out.shape == (N, OC, H // STRIDE, W // STRIDE), out.shape
    print("KERNEL_OK")
</pallas_src>

<mosaic_0001>
module attributes {stable_mosaic.version = 11 : i64} {
  func.func @conv_stats_kernel(%arg0: i32, %arg1: i32, %arg2: memref<128x128xbf16, #tpu.memory_space<vmem>>, %arg3: memref<128x128xbf16, #tpu.memory_space<vmem>>, %arg4: memref<128x128xf32, #tpu.memory_space<vmem>>, %arg5: memref<8x128xf32, #tpu.memory_space<vmem>>, %arg6: memref<128x128xf32, #tpu.memory_space<vmem>>) attributes {dimension_semantics = [#tpu.dimension_semantics<arbitrary>, #tpu.dimension_semantics<arbitrary>], iteration_bounds = array<i64: 1, 1>, scalar_prefetch = 0 : i64, scratch_operands = 1 : i64, tpu.core_type = #tpu.core_type<tc>, window_params = [{transform_indices = @transform_0, window_bounds = array<i64: 128, 128>}, {transform_indices = @transform_1, window_bounds = array<i64: 128, 128>}, {transform_indices = @transform_2, window_bounds = array<i64: 128, 128>}, {pipeline_mode = #tpu.pipeline_mode<synchronous>, transform_indices = @transform_3, window_bounds = array<i64: 8, 128>}]} {
    %c0_i32 = arith.constant 0 : i32
    %0 = arith.cmpi eq, %arg0, %c0_i32 : i32
    %c0_i32_0 = arith.constant 0 : i32
    %1 = arith.cmpi eq, %arg1, %c0_i32_0 : i32
    %2 = arith.andi %0, %1 : i1
    %3 = arith.extui %2 : i1 to i32
    %c0_i32_1 = arith.constant 0 : i32
    %4 = arith.cmpi ne, %3, %c0_i32_1 : i32
    scf.if %4 {
      %cst_13 = arith.constant 0.000000e+00 : f32
      %17 = vector.broadcast %cst_13 : f32 to vector<8x128xf32>
      %c0_14 = arith.constant 0 : index
      %c0_15 = arith.constant 0 : index
      %18 = vector.load %arg5[%c0_14, %c0_15] : memref<8x128xf32, #tpu.memory_space<vmem>>, vector<8x128xf32>
      tpu.vector_store %arg5[%c0_14, %c0_15], %17 {strides = array<i32>} : memref<8x128xf32, #tpu.memory_space<vmem>>, vector<8x128xf32>,
    } else {
    }
    %c0_i32_2 = arith.constant 0 : i32
    %5 = arith.cmpi eq, %arg1, %c0_i32_2 : i32
    %6 = arith.extui %5 : i1 to i32
    %c0_i32_3 = arith.constant 0 : i32
    %7 = arith.cmpi ne, %6, %c0_i32_3 : i32
    scf.if %7 {
      %cst_13 = arith.constant 0.000000e+00 : f32
      %17 = vector.broadcast %cst_13 : f32 to vector<128x128xf32>
      %c0_14 = arith.constant 0 : index
      %c0_15 = arith.constant 0 : index
      %18 = vector.load %arg6[%c0_14, %c0_15] : memref<128x128xf32, #tpu.memory_space<vmem>>, vector<128x128xf32>
      tpu.vector_store %arg6[%c0_14, %c0_15], %17 {strides = array<i32>} : memref<128x128xf32, #tpu.memory_space<vmem>>, vector<128x128xf32>,
    } else {
    }
    %c0 = arith.constant 0 : index
    %c0_4 = arith.constant 0 : index
    %8 = vector.load %arg6[%c0, %c0_4] : memref<128x128xf32, #tpu.memory_space<vmem>>, vector<128x128xf32>
    %c0_5 = arith.constant 0 : index
    %c0_6 = arith.constant 0 : index
    %9 = vector.load %arg2[%c0_5, %c0_6] : memref<128x128xbf16, #tpu.memory_space<vmem>>, vector<128x128xbf16>
    %c0_7 = arith.constant 0 : index
    %c0_8 = arith.constant 0 : index
    %10 = vector.load %arg3[%c0_7, %c0_8] : memref<128x128xbf16, #tpu.memory_space<vmem>>, vector<128x128xbf16>
    %cst = arith.constant dense<0.000000e+00> : vector<128x128xf32>
    %11 = tpu.matmul %9, %10, %cst {dimension_numbers = #tpu.dot_dimension_numbers<[1], [0], [0], [1], [0, 0, 1, 1], [], []>} : vector<128x128xbf16>, vector<128x128xbf16>, vector<128x128xf32> -> vector<128x128xf32>
    %12 = arith.addf %8, %11 : vector<128x128xf32>
    %c0_9 = arith.constant 0 : index
    %c0_10 = arith.constant 0 : index
    %13 = vector.load %arg6[%c0_9, %c0_10] : memref<128x128xf32, #tpu.memory_space<vmem>>, vector<128x128xf32>
    tpu.vector_store %arg6[%c0_9, %c0_10], %12 {strides = array<i32>} : memref<128x128xf32, #tpu.memory_space<vmem>>, vector<128x128xf32>,
    %c0_i32_11 = arith.constant 0 : i32
    %14 = arith.cmpi eq, %arg1, %c0_i32_11 : i32
    %15 = arith.extui %14 : i1 to i32
    %c0_i32_12 = arith.constant 0 : i32
    %16 = arith.cmpi ne, %15, %c0_i32_12 : i32
    scf.if %16 {
      %c0_13 = arith.constant 0 : index
      %c0_14 = arith.constant 0 : index
      %17 = vector.load %arg6[%c0_13, %c0_14] : memref<128x128xf32, #tpu.memory_space<vmem>>, vector<128x128xf32>
      %c0_15 = arith.constant 0 : index
      %c0_16 = arith.constant 0 : index
      %18 = vector.load %arg4[%c0_15, %c0_16] : memref<128x128xf32, #tpu.memory_space<vmem>>, vector<128x128xf32>
      tpu.vector_store %arg4[%c0_15, %c0_16], %17 {strides = array<i32>} : memref<128x128xf32, #tpu.memory_space<vmem>>, vector<128x128xf32>,
      %c0_17 = arith.constant 0 : index
      %c0_18 = arith.constant 0 : index
      %19 = vector.load %arg5[%c0_17, %c0_18] : memref<8x128xf32, #tpu.memory_space<vmem>>, vector<1x128xf32>
      %cst_19 = arith.constant dense<0.000000e+00> : vector<128xf32>
      %20 = vector.multi_reduction <add>, %17, %cst_19 [0] : vector<128x128xf32> to vector<128xf32>
      %21 = vector.shape_cast %20 : vector<128xf32> to vector<1x128xf32>
      %22 = arith.addf %19, %21 : vector<1x128xf32>
      %c0_20 = arith.constant 0 : index
      %c0_21 = arith.constant 0 : index
      %23 = vector.load %arg5[%c0_20, %c0_21] : memref<8x128xf32, #tpu.memory_space<vmem>>, vector<1x128xf32>
      tpu.vector_store %arg5[%c0_20, %c0_21], %22 {strides = array<i32>} : memref<8x128xf32, #tpu.memory_space<vmem>>, vector<1x128xf32>,
      %c1 = arith.constant 1 : index
      %c0_22 = arith.constant 0 : index
      %24 = vector.load %arg5[%c1, %c0_22] : memref<8x128xf32, #tpu.memory_space<vmem>>, vector<1x128xf32>
      %25 = arith.mulf %17, %17 : vector<128x128xf32>
      %cst_23 = arith.constant dense<0.000000e+00> : vector<128xf32>
      %26 = vector.multi_reduction <add>, %25, %cst_23 [0] : vector<128x128xf32> to vector<128xf32>
      %27 = vector.shape_cast %26 : vector<128xf32> to vector<1x128xf32>
      %28 = arith.addf %24, %27 : vector<1x128xf32>
      %c1_24 = arith.constant 1 : index
      %c0_25 = arith.constant 0 : index
      %29 = vector.load %arg5[%c1_24, %c0_25] : memref<8x128xf32, #tpu.memory_space<vmem>>, vector<1x128xf32>
      tpu.vector_store %arg5[%c1_24, %c0_25], %28 {strides = array<i32>} : memref<8x128xf32, #tpu.memory_space<vmem>>, vector<1x128xf32>,
    } else {
    }
    return
  }
  func.func @transform_0(%arg0: i32, %arg1: i32) -> (i32, i32) {
    %c0_i32 = arith.constant 0 : i32
    return %arg0, %arg1 : i32, i32
  }
  func.func @transform_1(%arg0: i32, %arg1: i32) -> (i32, i32) {
    %c0_i32 = arith.constant 0 : i32
    %c0_i32_0 = arith.constant 0 : i32
    return %arg1, %c0_i32 : i32, i32
  }
  func.func @transform_2(%arg0: i32, %arg1: i32) -> (i32, i32) {
    %c0_i32 = arith.constant 0 : i32
    %c0_i32_0 = arith.constant 0 : i32
    return %arg0, %c0_i32 : i32, i32
  }
  func.func @transform_3(%arg0: i32, %arg1: i32) -> (i32, i32) {
    %c0_i32 = arith.constant 0 : i32
    %c0_i32_0 = arith.constant 0 : i32
    %c0_i32_1 = arith.constant 0 : i32
    return %c0_i32, %c0_i32_0 : i32, i32
  }
}

</mosaic_0001>

<bundles_post_ra>
// kernel: tpu_custom_call.1
= control target key start
LH: loop header
LB: loop body
LE: loop exit
PB: predicated region body
PF: predicated region fallthrough
CT: control target
= control target key end

     0   :  { %9 = vsyncpa [#allocation4], 0  ;;  %s770_s0 = inlined_call_operand.hbm [shape: bf16[128,128], index: 0, kind: input, shape index: {}]   ;;  %s771_s1 = inlined_call_operand.hbm [shape: bf16[128,128], index: 1, kind: input, shape index: {}]   ;;  %s772_s2 = inlined_call_operand.hbm [shape: f32[128,128], index: 2, kind: output, shape index: {0}]   ;;  %s773_s3 = inlined_call_operand.hbm [shape: f32[8,128], index: 3, kind: output, shape index: {1}]  }
   0x1   :  { %10 = vsyncpa [#allocation7], 0 }
   0x2   :  { %11 = vsyncpa [#allocation5], 0 }
   0x3   :  { %12 = vsyncpa [#allocation10], 0  ;;  %s675_s12 = smov [#allocation3]   ;;  %s579_s16 = scalar_lea.hbm %s770_s0, 1024 }
   0x4   :  { %s18_s13 = sshll.u32 %s675_s12, 4  ;;  %p580_p0 = scmp.ne.s32.totalorder %s770_s0, %s579_s16  ;;  %s19_s13 = int_to_ptr.vmem [resolvable:$true] %s18_s13 }
   0x5   :  { %p583_p1 = scmp.lt.u32.totalorder %s579_s16, %s770_s0 }
   0x7   :  { %p585_p2 = pnand %p583_p1, %p580_p0 }
   0x9   :  { %588 = shalt.err (!%p585_p2)
}
   0xa   :  { %s589_s21 = scalar_lea.vmem %s19_s13, 1024  ;;  %p594_p4 = scmp.lt.s32.totalorder %s19_s13, %s19_s13 }
   0xb   :  { %p590_p3 = scmp.ne.s32.totalorder %s19_s13, %s589_s21  ;;  %p595_p5 = scmp.lt.s32.totalorder %s589_s21, %s589_s21 }
   0xd   :  { %p596_p6 = por %p595_p5, %p594_p4 }
   0xf   :  { %p597_p7 = pnand %p596_p6, %p590_p3 }
  0x11   :  { %600 = shalt.err (!%p597_p7)
}
  0x12   :  { %s676_s22 = smov 64   ;;  %s677_s23 = smov 4  }
  0x13   :  { %24 = dma.hbm_to_vmem [thread:$0]  %s770_s0, 1024, %s19_s13, [#allocation4], %s676_s22, %s676_s22, %s677_s23  }
  0x14   :  { %s678_s26 = smov [#allocation6]   ;;  %s601_s30 = scalar_lea.hbm %s771_s1, 1024 }
  0x15   :  { %s30_s27 = sshll.u32 %s678_s26, 4  ;;  %p602_p8 = scmp.ne.s32.totalorder %s771_s1, %s601_s30  ;;  %s31_s27 = int_to_ptr.vmem [resolvable:$true] %s30_s27 }
  0x16   :  { %p605_p9 = scmp.lt.u32.totalorder %s601_s30, %s771_s1 }
  0x18   :  { %p607_p10 = pnand %p605_p9, %p602_p8 }
  0x1a   :  { %610 = shalt.err (!%p607_p10)
}
  0x1b   :  { %s611_s8 = scalar_lea.vmem %s31_s27, 1024  ;;  %p616_p12 = scmp.lt.s32.totalorder %s31_s27, %s31_s27 }
  0x1c   :  { %p612_p11 = scmp.ne.s32.totalorder %s31_s27, %s611_s8  ;;  %p617_p13 = scmp.lt.s32.totalorder %s611_s8, %s611_s8 }
  0x1e   :  { %p618_p0 = por %p617_p13, %p616_p12 }
  0x20   :  { %p619_p1 = pnand %p618_p0, %p612_p11 }
  0x22   :  { %622 = shalt.err (!%p619_p1)
}
  0x23   :  { %36 = dma.hbm_to_vmem [thread:$0]  %s771_s1, 1024, %s31_s27, [#allocation7], %s676_s22, %s676_s22, %s677_s23  }
  0x24   :  { %667 = dma.done.wait [#allocation4], 1024  }
  0x25   :  { %668 = vsyncadd [#allocation4], 4294966272 }
  0x26   :  { %669 = dma.done.wait [#allocation7], 1024  }
  0x27   :  { %670 = vsyncadd [#allocation7], 4294966272  ;;  %v563_v0 = vld [vmem:[#allocation6] sm:$0xff]   ;;  %v564_v1 = vld [vmem:[#allocation6 + $0x8] sm:$0xff]   ;;  %v679_v16 = vmov 0.0   ;;  %s680_s1 = smov [#allocation8]  }
  0x28   :  { %506 = vmatprep.subr.bf16.mxu0 %v563_v0  ;;  %538 = vmatprep.subr.bf16.mxu1 %v563_v0  ;;  %v565_v2 = vld [vmem:[#allocation6 + $0x10] sm:$0xff]   ;;  %v566_v3 = vld [vmem:[#allocation6 + $0x18] sm:$0xff]   ;;  %v571_v4 = vld [vmem:[#allocation3] sm:$0xff]   ;;  %50 = vst [vmem:[#allocation9] sm:$0xff] %v679_v16  ;;  %s447_s10 = sshll.u32 %s680_s1, 4  ;;  %s448_s10 = int_to_ptr.vmem [resolvable:$true] %s447_s10 }
  0x29   :  { %507 = vmatpush3.bf16.msra.mxu0 %v563_v0  ;;  %546 = vmatpush3.bf16.msra.mxu1 %v563_v0  ;;  %v567_v5 = vld [vmem:[#allocation6 + $0x20] sm:$0xff]   ;;  %v568_v7 = vld [vmem:[#allocation6 + $0x28] sm:$0xff]   ;;  %v569_v8 = vld [vmem:[#allocation6 + $0x30] sm:$0xff]   ;;  %s623_s11 = scalar_lea.vmem %s448_s10, 2048  ;;  %p628_p3 = scmp.lt.s32.totalorder %s448_s10, %s448_s10 }
  0x2a   :  { %508 = vmatprep.subr.bf16.mxu0 %v564_v1  ;;  %539 = vmatprep.subr.bf16.mxu1 %v564_v1  ;;  %v575_v6 = vld [vmem:[#allocation3 + $0x20] sm:$0xff]   ;;  %v570_v9 = vld [vmem:[#allocation6 + $0x38] sm:$0xff]   ;;  %v572_v10 = vld [vmem:[#allocation3 + $0x8] sm:$0xff]   ;;  %p624_p2 = scmp.ne.s32.totalorder %s448_s10, %s623_s11  ;;  %p629_p4 = scmp.lt.s32.totalorder %s623_s11, %s623_s11 }
  0x2b   :  { %522 = vmatprep.mubr.bf16.mxu0 %v571_v4  ;;  %530 = vmatprep.mubr.bf16.mxu1 %v575_v6  ;;  %v576_v11 = vld [vmem:[#allocation3 + $0x28] sm:$0xff]   ;;  %v573_v12 = vld [vmem:[#allocation3 + $0x10] sm:$0xff]   ;;  %v574_v14 = vld [vmem:[#allocation3 + $0x18] sm:$0xff]  }
  0x2c   :  { %v577_v13 = vld [vmem:[#allocation3 + $0x30] sm:$0xff]   ;;  %v578_v15 = vld [vmem:[#allocation3 + $0x38] sm:$0xff]   ;;  %p630_p5 = por %p629_p4, %p628_p3 }
  0x2d   :  { %509 = vmatpush3.bf16.msra.mxu0 %v564_v1  ;;  %547 = vmatpush3.bf16.msra.mxu1 %v564_v1 }
  0x2e   :  { %510 = vmatprep.subr.bf16.mxu0 %v565_v2  ;;  %540 = vmatprep.subr.bf16.mxu1 %v565_v2  ;;  %p631_p6 = pnand %p630_p5, %p624_p2 }
  0x31   :  { %511 = vmatpush3.bf16.msra.mxu0 %v565_v2  ;;  %548 = vmatpush3.bf16.msra.mxu1 %v565_v2 }
  0x32   :  { %512 = vmatprep.subr.bf16.mxu0 %v566_v3  ;;  %541 = vmatprep.subr.bf16.mxu1 %v566_v3 }
  0x35   :  { %513 = vmatpush3.bf16.msra.mxu0 %v566_v3  ;;  %549 = vmatpush3.bf16.msra.mxu1 %v566_v3 }
  0x36   :  { %514 = vmatprep.subr.bf16.mxu0 %v567_v5  ;;  %542 = vmatprep.subr.bf16.mxu1 %v567_v5 }
  0x39   :  { %515 = vmatpush3.bf16.msra.mxu0 %v567_v5  ;;  %550 = vmatpush3.bf16.msra.mxu1 %v567_v5 }
  0x3a   :  { %516 = vmatprep.subr.bf16.mxu0 %v568_v7  ;;  %543 = vmatprep.subr.bf16.mxu1 %v568_v7 }
  0x3d   :  { %517 = vmatpush3.bf16.msra.mxu0 %v568_v7  ;;  %551 = vmatpush3.bf16.msra.mxu1 %v568_v7 }
  0x3e   :  { %518 = vmatprep.subr.bf16.mxu0 %v569_v8  ;;  %544 = vmatprep.subr.bf16.mxu1 %v569_v8 }
  0x41   :  { %519 = vmatpush3.bf16.msra.mxu0 %v569_v8  ;;  %552 = vmatpush3.bf16.msra.mxu1 %v569_v8 }
  0x42   :  { %520 = vmatprep.subr.bf16.mxu0 %v570_v9  ;;  %545 = vmatprep.subr.bf16.mxu1 %v570_v9 }
  0x45   :  { %521 = vmatpush3.bf16.msra.mxu0 %v570_v9  ;;  %553 = vmatpush3.bf16.msra.mxu1 %v570_v9 }
  0x48   :  { %523 = vmatmul.mubr.bf16.vlgmr.msra.gmra.mrb[0].mxu0 %v572_v10  ;;  %531 = vmatmul.mubr.bf16.vlgmr.msra.gmra.mrb[0].mxu1 %v576_v11 }
  0x49   :  { %526 = vmatprep.mubr.bf16.mxu0 %v573_v12  ;;  %534 = vmatprep.mubr.bf16.mxu1 %v577_v13 }
  0x50   :  { %527 = vmatmul.mubr.bf16.gmra.mrb[4].mxu0 %v574_v14  ;;  %535 = vmatmul.mubr.bf16.gmra.mrb[4].mxu1 %v578_v15 }
 0x11b   :  { %v524_v17 = vpop.f32.mrb[0].mxu0  ;;  %v728_v18 = vpop.f32.mrb[0].mxu1 }
 0x11c   :  { %364 = vst [vmem:[#allocation8 + $0x10] sm:$0xff] %v524_v17  ;;  %v248_v19 = vpop.f32.mrb[1].mxu0  ;;  %372 = vst [vmem:[#allocation8 + $0x50] sm:$0xff] %v728_v18  ;;  %v731_v20 = vpop.f32.mrb[1].mxu1  ;;  %v405_v28 = vmul.f32 %v524_v17, %v524_v17 }
 0x11d   :  { %362 = vst [vmem:[#allocation8] sm:$0xff] %v248_v19  ;;  %v525_v21 = vpop.f32.mrb[2].mxu0  ;;  %370 = vst [vmem:[#allocation8 + $0x40] sm:$0xff] %v731_v20  ;;  %v734_v22 = vpop.f32.mrb[2].mxu1  ;;  %v403_v25 = vmul.f32 %v248_v19, %v248_v19 }
 0x11e   :  { %365 = vst [vmem:[#allocation8 + $0x18] sm:$0xff] %v525_v21  ;;  %v251_v23 = vpop.f32.mrb[3].mxu0  ;;  %373 = vst [vmem:[#allocation8 + $0x58] sm:$0xff] %v734_v22  ;;  %v283_v24 = vpop.f32.mrb[3].mxu1  ;;  %v406_v31 = vmul.f32 %v525_v21, %v525_v21 }
 0x11f   :  { %363 = vst [vmem:[#allocation8 + $0x8] sm:$0xff] %v251_v23  ;;  %v379_v26 = vadd.f32 %v251_v23, %v248_v19  ;;  %v404_v27 = vmul.f32 %v251_v23, %v251_v23  ;;  %371 = vst [vmem:[#allocation8 + $0x48] sm:$0xff] %v283_v24 }
 0x121   :  { %v380_v29 = vadd.f32 %v524_v17, %v379_v26  ;;  %v419_v30 = vadd.f32 %v404_v27, %v403_v25 }
 0x123   :  { %v420_v32 = vadd.f32 %v419_v30, %v405_v28  ;;  %v528_v33 = vpop.f32.mrb[4].mxu0  ;;  %v381_v34 = vadd.f32 %v525_v21, %v380_v29  ;;  %v536_v35 = vpop.f32.mrb[4].mxu1 }
 0x124   :  { %368 = vst [vmem:[#allocation8 + $0x30] sm:$0xff] %v528_v33  ;;  %v264_v36 = vpop.f32.mrb[5].mxu0  ;;  %376 = vst [vmem:[#allocation8 + $0x70] sm:$0xff] %v536_v35  ;;  %v296_v37 = vpop.f32.mrb[5].mxu1 }
 0x125   :  { %366 = vst [vmem:[#allocation8 + $0x20] sm:$0xff] %v264_v36  ;;  %v382_v38 = vadd.f32 %v381_v34, %v264_v36  ;;  %v407_v39 = vmul.f32 %v264_v36, %v264_v36  ;;  %v421_v40 = vadd.f32 %v420_v32, %v406_v31  ;;  %v529_v41 = vpop.f32.mrb[6].mxu0  ;;  %374 = vst [vmem:[#allocation8 + $0x60] sm:$0xff] %v296_v37  ;;  %v537_v42 = vpop.f32.mrb[6].mxu1 }
 0x126   :  { %369 = vst [vmem:[#allocation8 + $0x38] sm:$0xff] %v529_v41  ;;  %v267_v43 = vpop.f32.mrb[7].mxu0  ;;  %377 = vst [vmem:[#allocation8 + $0x78] sm:$0xff] %v537_v42  ;;  %v299_v44 = vpop.f32.mrb[7].mxu1 }
 0x127   :  { %v422_v45 = vadd.f32 %v421_v40, %v407_v39  ;;  %367 = vst [vmem:[#allocation8 + $0x28] sm:$0xff] %v267_v43  ;;  %v383_v46 = vadd.f32 %v382_v38, %v267_v43  ;;  %v408_v47 = vmul.f32 %v267_v43, %v267_v43  ;;  %375 = vst [vmem:[#allocation8 + $0x68] sm:$0xff] %v299_v44 }
 0x128   :  { %634 = shalt.err (!%p631_p6)
}
 0x129   :  { %s635_s14 = scalar_lea.hbm %s772_s2, 2048 }
 0x12a   :  { %p636_p7 = scmp.ne.s32.totalorder %s772_s2, %s635_s14  ;;  %p639_p8 = scmp.lt.u32.totalorder %s635_s14, %s772_s2 }
 0x12c   :  { %p641_p9 = pnand %p639_p8, %p636_p7 }
 0x12e   :  { %644 = shalt.err (!%p641_p9)
}
 0x12f   :  { %s681_s19 = smov 128   ;;  %s682_s20 = smov 8   ;;  %v409_v48 = vmul.f32 %v528_v33, %v528_v33  ;;  %v384_v49 = vadd.f32 %v528_v33, %v383_v46  ;;  %v423_v50 = vadd.f32 %v422_v45, %v408_v47  ;;  %v410_v51 = vmul.f32 %v529_v41, %v529_v41  ;;  %v402_v27 = vld [vmem:[#allocation9 + $0x1] sm:$0x1] }
 0x130   :  { %453 = dma.vmem_to_hbm [thread:$0]  %s448_s10, 2048, %s772_s2, [#allocation5], %s681_s19, %s681_s19, %s682_s20   ;;  %v411_v54 = vmul.f32 %v731_v20, %v731_v20  ;;  %v412_v59 = vmul.f32 %v283_v24, %v283_v24  ;;  %v413_v60 = vmul.f32 %v728_v18, %v728_v18  ;;  %v414_v63 = vmul.f32 %v734_v22, %v734_v22 }
 0x131   :  { %v424_v52 = vadd.f32 %v423_v50, %v409_v48  ;;  %v385_v53 = vadd.f32 %v529_v41, %v384_v49  ;;  %v415_v2 = vmul.f32 %v296_v37, %v296_v37  ;;  %v416_v7 = vmul.f32 %v299_v44, %v299_v44  ;;  %s683_s2 = smov [#allocation9]  }
 0x132   :  { %v417_v8 = vmul.f32 %v536_v35, %v536_v35  ;;  %v418_v11 = vmul.f32 %v537_v42, %v537_v42  ;;  %s460_s23 = sshll.u32 %s683_s2, 4  ;;  %s461_s23 = int_to_ptr.vmem [resolvable:$true] %s460_s23 }
 0x133   :  { %v386_v55 = vadd.f32 %v385_v53, %v731_v20  ;;  %v425_v56 = vadd.f32 %v424_v52, %v410_v51  ;;  %s645_s24 = scalar_lea.vmem %s461_s23, 128  ;;  %p650_p11 = scmp.lt.s32.totalorder %s461_s23, %s461_s23 }
 0x134   :  { %p646_p10 = scmp.ne.s32.totalorder %s461_s23, %s645_s24  ;;  %p651_p12 = scmp.lt.s32.totalorder %s645_s24, %s645_s24 }
 0x135   :  { %v426_v57 = vadd.f32 %v425_v56, %v411_v54  ;;  %v387_v58 = vadd.f32 %v386_v55, %v283_v24  ;;  %v378_v24 = vld [vmem:[#allocation9] sm:$0x1] }
 0x136   :  { %p652_p13 = por %p651_p12, %p650_p11 }
 0x137   :  { %v388_v61 = vadd.f32 %v728_v18, %v387_v58  ;;  %v427_v62 = vadd.f32 %v426_v57, %v412_v59 }
 0x138   :  { %p653_p0 = pnand %p652_p13, %p646_p10 }
 0x139   :  { %v428_v0 = vadd.f32 %v427_v62, %v413_v60  ;;  %v389_v1 = vadd.f32 %v734_v22, %v388_v61 }
 0x13b   :  { %v390_v3 = vadd.f32 %v389_v1, %v296_v37  ;;  %v429_v4 = vadd.f32 %v428_v0, %v414_v63 }
 0x13d   :  { %v430_v5 = vadd.f32 %v429_v4, %v415_v2  ;;  %v391_v6 = vadd.f32 %v390_v3, %v299_v44 }
 0x13f   :  { %v392_v9 = vadd.f32 %v536_v35, %v391_v6  ;;  %v431_v10 = vadd.f32 %v430_v5, %v416_v7 }
 0x141   :  { %v393_v12 = vadd.f32 %v537_v42, %v392_v9  ;;  %v432_v13 = vadd.f32 %v431_v10, %v417_v8 }
 0x143   :  { %v394_v14 = vrot.slane %v393_v12, 4  ;;  %v433_v15 = vadd.f32 %v432_v13, %v418_v11 }
 0x145   :  { %v395_v16 = vadd.f32 %v394_v14, %v393_v12  ;;  %v434_v17 = vrot.slane %v433_v15, 4 }
 0x147   :  { %v396_v18 = vrot.slane %v395_v16, 2  ;;  %v435_v19 = vadd.f32 %v434_v17, %v433_v15 }
 0x149   :  { %v397_v20 = vadd.f32 %v396_v18, %v395_v16  ;;  %v436_v21 = vrot.slane %v435_v19, 2 }
 0x14b   :  { %v398_v22 = vrot.slane %v397_v20, 1  ;;  %v437_v23 = vadd.f32 %v436_v21, %v435_v19 }
 0x14d   :  { %v399_v25 = vadd.f32 %v398_v22, %v397_v20  ;;  %v438_v26 = vrot.slane %v437_v23, 1 }
 0x14f   :  { %v400_v28 = vadd.f32 %v399_v25, %v378_v24  ;;  %v439_v29 = vadd.f32 %v438_v26, %v437_v23 }
 0x151   :  { %401 = vst [vmem:[#allocation9] sm:$0x1] %v400_v28  ;;  %v440_v30 = vadd.f32 %v439_v29, %v402_v27 }
 0x153   :  { %441 = vst [vmem:[#allocation9 + $0x1] sm:$0x1] %v440_v30 }
 0x154   :  { %656 = shalt.err (!%p653_p0)
}
 0x155   :  { %s657_s27 = scalar_lea.hbm %s773_s3, 128 }
 0x156   :  { %p658_p1 = scmp.ne.s32.totalorder %s773_s3, %s657_s27  ;;  %p661_p2 = scmp.lt.u32.totalorder %s657_s27, %s773_s3 }
 0x158   :  { %p663_p3 = pnand %p661_p2, %p658_p1 }
 0x15a   :  { %666 = shalt.err (!%p663_p3)
}
 0x15b   :  { %463 = dma.vmem_to_hbm [thread:$0]  %s461_s23, 128, %s773_s3, [#allocation10]  }
 0x15c   :  { %671 = dma.done.wait [#allocation5], 2048  }
 0x15d   :  { %672 = vsyncadd [#allocation5], 4294965248 }
 0x15e   :  { %673 = dma.done.wait [#allocation10], 128  }
 0x15f   :  { %674 = vsyncadd [#allocation10], 4294967168 }
 0x160   :  { %470 = vsyncpa [#allocation4], 1 }
 0x161   :  { %471 = vsyncpa [#allocation7], 1 }
 0x162   :  { %472 = vsyncpa [#allocation5], 1 }
 0x163   :  { %473 = vsyncpa [#allocation10], 1 }

</bundles_post_ra>
